<compile_context>
chip_gen: v5e
topology: v5e:2x2
jax: 0.10.0
libtpu: 0.0.40
codegen_flags: <defaults>
</compile_context>

<pallas_src>
import functools

import jax
import jax.numpy as jnp
from jax.experimental import pallas as pl
from jax.experimental.pallas import tpu as pltpu


def _round_up(x, m):
    return ((x + m - 1) // m) * m


def _pick_hidden_tile(H, target):
    """Largest multiple of 128 that divides H and is <= target (falls back to H)."""
    if H % 128 != 0:
        return H
    cand = min((target // 128) * 128, H)
    while cand >= 128:
        if H % cand == 0:
            return cand
        cand -= 128
    return H


def ffn_kernel(x_ref, w1_ref, b1_ref, w2_ref, b2_ref, o_ref, acc_ref):
    h_idx = pl.program_id(1)

    @pl.when(h_idx == 0)
    def _():
        acc_ref[...] = jnp.zeros_like(acc_ref)

    # Linear 1 over this hidden slice (+ bias slice, ReLU), f32 accumulation.
    h = jnp.dot(x_ref[...], w1_ref[...], preferred_element_type=jnp.float32)
    h = jnp.maximum(h + b1_ref[...].astype(jnp.float32), 0.0)

    # Linear 2 partial product for this hidden slice, accumulated in f32 scratch.
    acc_ref[...] += jnp.dot(h.astype(w2_ref.dtype), w2_ref[...],
                            preferred_element_type=jnp.float32)

    @pl.when(h_idx == pl.num_programs(1) - 1)
    def _():
        o_ref[...] = (acc_ref[...] + b2_ref[...].astype(jnp.float32)).astype(o_ref.dtype)


@functools.partial(jax.jit, static_argnames=("tm", "th"))
def feedforward(x, w1, b1, w2, b2, *, tm=256, th=512):
    """x: (B, T, C); w1: (C, H); b1: (H,); w2: (H, C); b2: (C,)."""
    B, T, C = x.shape
    H = w1.shape[1]
    M = B * T

    # Row tile: big for MXU occupancy, clamped to the (sublane-padded) row count.
    tm_eff = min(_round_up(max(tm, 8), 8), _round_up(M, 8))
    # Hidden tile: multiple of 128 that divides H (keeps reduction padding-free).
    th_eff = _pick_hidden_tile(H, th)

    x2d = x.reshape(M, C)
    b1_2d = b1.reshape(1, H)
    b2_2d = b2.reshape(1, C)

    grid = (pl.cdiv(M, tm_eff), H // th_eff)

    a_bytes = jnp.dtype(x.dtype).itemsize
    w_bytes = jnp.dtype(w1.dtype).itemsize
    # Double-buffered input/output tiles + f32 accumulator scratch, 25% headroom.
    vmem_bytes = int(1.25 * (
        2 * tm_eff * C * a_bytes          # x tiles
        + 2 * C * th_eff * w_bytes        # W1 slices
        + 2 * th_eff * C * w_bytes        # W2 slices
        + 2 * (th_eff + C) * w_bytes      # bias slices
        + 2 * tm_eff * C * a_bytes        # output tiles
        + tm_eff * C * 4                  # accumulator
    ))
    vmem_bytes = max(16 << 20, min(vmem_bytes, 100 << 20))

    cost = pl.CostEstimate(
        flops=4 * M * C * H,  # two matmuls: 2*M*C*H each
        transcendentals=0,
        bytes_accessed=(x2d.size * a_bytes + (w1.size + w2.size + b1.size + b2.size) * w_bytes
                        + M * C * a_bytes),
    )

    out2d = pl.pallas_call(
        ffn_kernel,
        out_shape=jax.ShapeDtypeStruct((M, C), x.dtype),
        grid_spec=pltpu.PrefetchScalarGridSpec(
            num_scalar_prefetch=0,
            grid=grid,
            in_specs=[
                pl.BlockSpec((tm_eff, C), lambda i, h: (i, 0)),   # x row tile
                pl.BlockSpec((C, th_eff), lambda i, h: (0, h)),   # W1 hidden slice
                pl.BlockSpec((1, th_eff), lambda i, h: (0, h)),   # b1 hidden slice
                pl.BlockSpec((th_eff, C), lambda i, h: (h, 0)),   # W2 hidden slice
                pl.BlockSpec((1, C), lambda i, h: (0, 0)),        # b2 (resident)
            ],
            out_specs=pl.BlockSpec((tm_eff, C), lambda i, h: (i, 0)),
            scratch_shapes=[pltpu.VMEM((tm_eff, C), jnp.float32)],
        ),
        compiler_params=pltpu.CompilerParams(
            dimension_semantics=("parallel", "arbitrary"),
            vmem_limit_bytes=vmem_bytes,
        ),
        cost_estimate=cost,
    )(x2d, w1, b1_2d, w2, b2_2d)

    return out2d.reshape(B, T, C)


def init_linear_params(key, in_features, out_features, dtype=jnp.float32):
    """Deterministic init matching nn.Linear's uniform(-1/sqrt(fan_in), ...)."""
    k_w, k_b = jax.random.split(key)
    bound = 1.0 / (in_features ** 0.5)
    # Stored as (in, out) so the kernel does x @ W (== x @ W_torch.T).
    w = jax.random.uniform(k_w, (in_features, out_features), dtype,
                           minval=-bound, maxval=bound)
    b = jax.random.uniform(k_b, (out_features,), dtype,
                           minval=-bound, maxval=bound)
    return w, b


if __name__ == "__main__":
    # Small shapes consistent with the module: (B, T, n_embd), hidden = 4*n_embd.
    B, T, n_embd = 2, 8, 128
    hidden = 4 * n_embd

    key = jax.random.PRNGKey(0)
    k_x, k_l1, k_l2 = jax.random.split(key, 3)

    x = jax.random.normal(k_x, (B, T, n_embd), jnp.float32)
    w1, b1 = init_linear_params(k_l1, n_embd, hidden)
    w2, b2 = init_linear_params(k_l2, hidden, n_embd)

    # Default tiling (single hidden step at this small size).
    out = feedforward(x, w1, b1, w2, b2)
    # Also exercise the hidden-dim reduction/accumulator path (grid = (1, 2)).
    out_tiled = feedforward(x, w1, b1, w2, b2, th=256)
    out, out_tiled = jax.block_until_ready((out, out_tiled))

    # Reference check in plain JAX (same math as the PyTorch module).
    ref = jnp.maximum(x.reshape(-1, n_embd) @ w1 + b1, 0.0) @ w2 + b2
    ref = ref.reshape(B, T, n_embd)
    assert out.shape == (B, T, n_embd)
    assert jnp.allclose(out, ref, atol=1e-4, rtol=1e-4)
    assert jnp.allclose(out_tiled, ref, atol=1e-4, rtol=1e-4)

    print("KERNEL_OK")
</pallas_src>

<mosaic_0001>
module attributes {stable_mosaic.version = 11 : i64} {
  func.func @ffn_kernel(%arg0: i32, %arg1: i32, %arg2: memref<16x128xf32, #tpu.memory_space<vmem>>, %arg3: memref<128x512xf32, #tpu.memory_space<vmem>>, %arg4: memref<1x512xf32, #tpu.memory_space<vmem>>, %arg5: memref<512x128xf32, #tpu.memory_space<vmem>>, %arg6: memref<1x128xf32, #tpu.memory_space<vmem>>, %arg7: memref<16x128xf32, #tpu.memory_space<vmem>>, %arg8: memref<16x128xf32, #tpu.memory_space<vmem>>) attributes {dimension_semantics = [#tpu.dimension_semantics<parallel>, #tpu.dimension_semantics<arbitrary>], iteration_bounds = array<i64: 1, 1>, scalar_prefetch = 0 : i64, scratch_operands = 1 : i64, tpu.core_type = #tpu.core_type<tc>, window_params = [{transform_indices = @transform_0, window_bounds = array<i64: 16, 128>}, {transform_indices = @transform_1, window_bounds = array<i64: 128, 512>}, {transform_indices = @transform_2, window_bounds = array<i64: 1, 512>}, {transform_indices = @transform_3, window_bounds = array<i64: 512, 128>}, {pipeline_mode = #tpu.pipeline_mode<synchronous>, transform_indices = @transform_4, window_bounds = array<i64: 1, 128>}, {transform_indices = @transform_5, window_bounds = array<i64: 16, 128>}]} {
    %c0_i32 = arith.constant 0 : i32
    %0 = arith.cmpi eq, %arg1, %c0_i32 : i32
    %1 = arith.extui %0 : i1 to i32
    %c0_i32_0 = arith.constant 0 : i32
    %2 = arith.cmpi ne, %1, %c0_i32_0 : i32
    scf.if %2 {
      %cst_16 = arith.constant 0.000000e+00 : f32
      %19 = vector.broadcast %cst_16 : f32 to vector<16x128xf32>
      %c0_17 = arith.constant 0 : index
      %c0_18 = arith.constant 0 : index
      %20 = vector.load %arg8[%c0_17, %c0_18] : memref<16x128xf32, #tpu.memory_space<vmem>>, vector<16x128xf32>
      tpu.vector_store %arg8[%c0_17, %c0_18], %19 {strides = array<i32>} : memref<16x128xf32, #tpu.memory_space<vmem>>, vector<16x128xf32>,
    } else {
    }
    %c0 = arith.constant 0 : index
    %c0_1 = arith.constant 0 : index
    %3 = vector.load %arg2[%c0, %c0_1] : memref<16x128xf32, #tpu.memory_space<vmem>>, vector<16x128xf32>
    %c0_2 = arith.constant 0 : index
    %c0_3 = arith.constant 0 : index
    %4 = vector.load %arg3[%c0_2, %c0_3] : memref<128x512xf32, #tpu.memory_space<vmem>>, vector<128x512xf32>
    %cst = arith.constant dense<0.000000e+00> : vector<16x512xf32>
    %5 = tpu.matmul %3, %4, %cst {dimension_numbers = #tpu.dot_dimension_numbers<[1], [0], [0], [1], [0, 0, 1, 1], [], []>} : vector<16x128xf32>, vector<128x512xf32>, vector<16x512xf32> -> vector<16x512xf32>
    %c0_4 = arith.constant 0 : index
    %c0_5 = arith.constant 0 : index
    %6 = vector.load %arg4[%c0_4, %c0_5] : memref<1x512xf32, #tpu.memory_space<vmem>>, vector<1x512xf32>
    %7 = vector.broadcast %6 : vector<1x512xf32> to vector<16x512xf32>
    %8 = arith.addf %5, %7 : vector<16x512xf32>
    %cst_6 = arith.constant 0.000000e+00 : f32
    %9 = vector.broadcast %cst_6 : f32 to vector<16x512xf32>
    %10 = arith.maximumf %8, %9 : vector<16x512xf32>
    %c0_7 = arith.constant 0 : index
    %c0_8 = arith.constant 0 : index
    %11 = vector.load %arg8[%c0_7, %c0_8] : memref<16x128xf32, #tpu.memory_space<vmem>>, vector<16x128xf32>
    %c0_9 = arith.constant 0 : index
    %c0_10 = arith.constant 0 : index
    %12 = vector.load %arg5[%c0_9, %c0_10] : memref<512x128xf32, #tpu.memory_space<vmem>>, vector<512x128xf32>
    %cst_11 = arith.constant dense<0.000000e+00> : vector<16x128xf32>
    %13 = tpu.matmul %10, %12, %cst_11 {dimension_numbers = #tpu.dot_dimension_numbers<[1], [0], [0], [1], [0, 0, 1, 1], [], []>} : vector<16x512xf32>, vector<512x128xf32>, vector<16x128xf32> -> vector<16x128xf32>
    %14 = arith.addf %11, %13 : vector<16x128xf32>
    %c0_12 = arith.constant 0 : index
    %c0_13 = arith.constant 0 : index
    %15 = vector.load %arg8[%c0_12, %c0_13] : memref<16x128xf32, #tpu.memory_space<vmem>>, vector<16x128xf32>
    tpu.vector_store %arg8[%c0_12, %c0_13], %14 {strides = array<i32>} : memref<16x128xf32, #tpu.memory_space<vmem>>, vector<16x128xf32>,
    %c0_i32_14 = arith.constant 0 : i32
    %16 = arith.cmpi eq, %arg1, %c0_i32_14 : i32
    %17 = arith.extui %16 : i1 to i32
    %c0_i32_15 = arith.constant 0 : i32
    %18 = arith.cmpi ne, %17, %c0_i32_15 : i32
    scf.if %18 {
      %c0_16 = arith.constant 0 : index
      %c0_17 = arith.constant 0 : index
      %19 = vector.load %arg8[%c0_16, %c0_17] : memref<16x128xf32, #tpu.memory_space<vmem>>, vector<16x128xf32>
      %c0_18 = arith.constant 0 : index
      %c0_19 = arith.constant 0 : index
      %20 = vector.load %arg6[%c0_18, %c0_19] : memref<1x128xf32, #tpu.memory_space<vmem>>, vector<1x128xf32>
      %21 = vector.broadcast %20 : vector<1x128xf32> to vector<16x128xf32>
      %22 = arith.addf %19, %21 : vector<16x128xf32>
      %c0_20 = arith.constant 0 : index
      %c0_21 = arith.constant 0 : index
      %23 = vector.load %arg7[%c0_20, %c0_21] : memref<16x128xf32, #tpu.memory_space<vmem>>, vector<16x128xf32>
      tpu.vector_store %arg7[%c0_20, %c0_21], %22 {strides = array<i32>} : memref<16x128xf32, #tpu.memory_space<vmem>>, vector<16x128xf32>,
    } else {
    }
    return
  }
  func.func @transform_0(%arg0: i32, %arg1: i32) -> (i32, i32) {
    %c0_i32 = arith.constant 0 : i32
    %c0_i32_0 = arith.constant 0 : i32
    return %arg0, %c0_i32 : i32, i32
  }
  func.func @transform_1(%arg0: i32, %arg1: i32) -> (i32, i32) {
    %c0_i32 = arith.constant 0 : i32
    %c0_i32_0 = arith.constant 0 : i32
    return %c0_i32, %arg1 : i32, i32
  }
  func.func @transform_2(%arg0: i32, %arg1: i32) -> (i32, i32) {
    %c0_i32 = arith.constant 0 : i32
    %c0_i32_0 = arith.constant 0 : i32
    return %c0_i32, %arg1 : i32, i32
  }
  func.func @transform_3(%arg0: i32, %arg1: i32) -> (i32, i32) {
    %c0_i32 = arith.constant 0 : i32
    %c0_i32_0 = arith.constant 0 : i32
    return %arg1, %c0_i32 : i32, i32
  }
  func.func @transform_4(%arg0: i32, %arg1: i32) -> (i32, i32) {
    %c0_i32 = arith.constant 0 : i32
    %c0_i32_0 = arith.constant 0 : i32
    %c0_i32_1 = arith.constant 0 : i32
    return %c0_i32, %c0_i32_0 : i32, i32
  }
  func.func @transform_5(%arg0: i32, %arg1: i32) -> (i32, i32) {
    %c0_i32 = arith.constant 0 : i32
    %c0_i32_0 = arith.constant 0 : i32
    return %arg0, %c0_i32 : i32, i32
  }
}

</mosaic_0001>

<bundles_post_ra>
// kernel: feedforward.1
= control target key start
LH: loop header
LB: loop body
LE: loop exit
PB: predicated region body
PF: predicated region fallthrough
CT: control target
= control target key end

     0   :  { %10 = vsyncpa [#allocation4], 0  ;;  %s621_s0 = inlined_call_operand.hbm [shape: f32[16,128], index: 0, kind: input, shape index: {}]   ;;  %s622_s1 = inlined_call_operand.hbm [shape: f32[128,512], index: 1, kind: input, shape index: {}]   ;;  %s623_s2 = inlined_call_operand.vmem [shape: f32[1,512], index: 2, kind: input, shape index: {}]   ;;  %s624_s3 = inlined_call_operand.hbm [shape: f32[512,128], index: 3, kind: input, shape index: {}]   ;;  %s625_s4 = inlined_call_operand.vmem [shape: f32[1,128], index: 4, kind: input, shape index: {}]   ;;  %s626_s5 = inlined_call_operand.hbm [shape: f32[16,128], index: 5, kind: output, shape index: {}]  }
   0x1   :  { %11 = vsyncpa [#allocation7], 0  ;;  %s30_s20 = sshll.u32 %s622_s1, 4  ;;  %s31_s20 = int_to_ptr.hbm [resolvable:$true] %s30_s20 }
   0x2   :  { %12 = vsyncpa [#allocation5], 0  ;;  %s556_s21 = smov [#allocation6]   ;;  %s17_s25 = sshll.u32 %s621_s0, 4  ;;  %s18_s25 = int_to_ptr.hbm [resolvable:$true] %s17_s25 }
   0x3   :  { %s32_s22 = sshll.u32 %s556_s21, 4  ;;  %s557_s26 = smov 512   ;;  %s33_s22 = int_to_ptr.vmem [resolvable:$true] %s32_s22 }
   0x4   :  { %s558_s27 = smov 32   ;;  %s559_s28 = smov [#allocation3]  }
   0x5   :  { %38 = dma.hbm_to_vmem [thread:$0]  %s31_s20, 8192, %s33_s22, [#allocation7], %s557_s26, %s557_s26, %s558_s27  }
   0x6   :  { %s19_s29 = sshll.u32 %s559_s28, 4  ;;  %s560_s30 = smov 128   ;;  %s20_s29 = int_to_ptr.vmem [resolvable:$true] %s19_s29 }
   0x7   :  { %s561_s6 = smov 8   ;;  %s45_s8 = sshll.u32 %s624_s3, 4  ;;  %s46_s8 = int_to_ptr.hbm [resolvable:$true] %s45_s8 }
   0x8   :  { %25 = dma.hbm_to_vmem [thread:$0]  %s18_s25, 256, %s20_s29, [#allocation4], %s560_s30, %s560_s30, %s561_s6  }
   0x9   :  { %s562_s9 = smov [#allocation8]  }
   0xa   :  { %s47_s0 = sshll.u32 %s562_s9, 4  ;;  %s48_s0 = int_to_ptr.vmem [resolvable:$true] %s47_s0 }
   0xb   :  { %53 = dma.hbm_to_vmem [thread:$0]  %s46_s8, 8192, %s48_s0, [#allocation7], %s560_s30, %s560_s30, %s561_s6  }
   0xc   :  { %550 = dma.done.wait [#allocation4], 256  }
   0xd   :  { %551 = vsyncadd [#allocation4], 4294967040 }
   0xe   :  { %552 = dma.done.wait [#allocation7], 16384  }
   0xf   :  { %553 = vsyncadd [#allocation7], 4294950912  ;;  %v138_v0 = vld [vmem:[#allocation6 + $0x1f0] sm:$0xff]  ;;  %v139_v2 = vld [vmem:[#allocation6 + $0x1f8] sm:$0xff]  ;;  %s563_s12 = smov [#allocation9]   ;;  %s431_s16 = sshll.u32 %s626_s5, 4  ;;  %s432_s16 = int_to_ptr.hbm [resolvable:$true] %s431_s16 }
  0x10   :  { %v134_v1 = vld [vmem:[#allocation6 + $0x1d0] sm:$0xff]  ;;  %196 = vmatpush.msra.mxu2 %v138_v0  ;;  %219 = vmatpush.msra.mxu3 %v139_v2  ;;  %v135_v3 = vld [vmem:[#allocation6 + $0x1d8] sm:$0xff]  ;;  %v136_v7 = vld [vmem:[#allocation6 + $0x1e0] sm:$0xff]  ;;  %s429_s13 = sshll.u32 %s563_s12, 4  ;;  %s430_s13 = int_to_ptr.vmem [resolvable:$true] %s429_s13 }
  0x11   :  { %v130_v4 = vld [vmem:[#allocation6 + $0x1b0] sm:$0xff]  ;;  %v131_v5 = vld [vmem:[#allocation6 + $0x1b8] sm:$0xff]  ;;  %v137_v8 = vld [vmem:[#allocation6 + $0x1e8] sm:$0xff]  ;;  %150 = vmatpush.msra.mxu0 %v136_v7 }
  0x12   :  { %197 = vmatpush.msra.mxu2 %v134_v1  ;;  %220 = vmatpush.msra.mxu3 %v135_v3  ;;  %v126_v6 = vld [vmem:[#allocation6 + $0x190] sm:$0xff]  ;;  %v127_v9 = vld [vmem:[#allocation6 + $0x198] sm:$0xff]  ;;  %v132_v10 = vld [vmem:[#allocation6 + $0x1c0] sm:$0xff] }
  0x13   :  { %173 = vmatpush.msra.mxu1 %v137_v8  ;;  %v133_v11 = vld [vmem:[#allocation6 + $0x1c8] sm:$0xff]  ;;  %v128_v12 = vld [vmem:[#allocation6 + $0x1a0] sm:$0xff]  ;;  %v122_v13 = vld [vmem:[#allocation6 + $0x170] sm:$0xff]  ;;  %151 = vmatpush.msra.mxu0 %v132_v10 }
  0x14   :  { %198 = vmatpush.msra.mxu2 %v130_v4  ;;  %221 = vmatpush.msra.mxu3 %v131_v5  ;;  %v123_v14 = vld [vmem:[#allocation6 + $0x178] sm:$0xff]  ;;  %v129_v15 = vld [vmem:[#allocation6 + $0x1a8] sm:$0xff]  ;;  %v124_v16 = vld [vmem:[#allocation6 + $0x180] sm:$0xff] }
  0x15   :  { %174 = vmatpush.msra.mxu1 %v133_v11  ;;  %v125_v17 = vld [vmem:[#allocation6 + $0x188] sm:$0xff]  ;;  %v118_v18 = vld [vmem:[#allocation6 + $0x150] sm:$0xff]  ;;  %v119_v19 = vld [vmem:[#allocation6 + $0x158] sm:$0xff]  ;;  %152 = vmatpush.msra.mxu0 %v128_v12 }
  0x16   :  { %199 = vmatpush.msra.mxu2 %v126_v6  ;;  %222 = vmatpush.msra.mxu3 %v127_v9  ;;  %v120_v20 = vld [vmem:[#allocation6 + $0x160] sm:$0xff]  ;;  %v121_v21 = vld [vmem:[#allocation6 + $0x168] sm:$0xff]  ;;  %v114_v22 = vld [vmem:[#allocation6 + $0x130] sm:$0xff] }
  0x17   :  { %175 = vmatpush.msra.mxu1 %v129_v15  ;;  %v115_v23 = vld [vmem:[#allocation6 + $0x138] sm:$0xff]  ;;  %153 = vmatpush.msra.mxu0 %v124_v16  ;;  %v116_v24 = vld [vmem:[#allocation6 + $0x140] sm:$0xff]  ;;  %v117_v25 = vld [vmem:[#allocation6 + $0x148] sm:$0xff] }
  0x18   :  { %200 = vmatpush.msra.mxu2 %v122_v13  ;;  %223 = vmatpush.msra.mxu3 %v123_v14  ;;  %v110_v26 = vld [vmem:[#allocation6 + $0x110] sm:$0xff]  ;;  %v111_v27 = vld [vmem:[#allocation6 + $0x118] sm:$0xff]  ;;  %v112_v28 = vld [vmem:[#allocation6 + $0x120] sm:$0xff] }
  0x19   :  { %176 = vmatpush.msra.mxu1 %v125_v17  ;;  %154 = vmatpush.msra.mxu0 %v120_v20  ;;  %v113_v29 = vld [vmem:[#allocation6 + $0x128] sm:$0xff]  ;;  %v106_v30 = vld [vmem:[#allocation6 + $0xf0] sm:$0xff]  ;;  %v107_v31 = vld [vmem:[#allocation6 + $0xf8] sm:$0xff] }
  0x1a   :  { %201 = vmatpush.msra.mxu2 %v118_v18  ;;  %224 = vmatpush.msra.mxu3 %v119_v19  ;;  %v108_v32 = vld [vmem:[#allocation6 + $0x100] sm:$0xff]  ;;  %v109_v33 = vld [vmem:[#allocation6 + $0x108] sm:$0xff]  ;;  %v102_v34 = vld [vmem:[#allocation6 + $0xd0] sm:$0xff] }
  0x1b   :  { %177 = vmatpush.msra.mxu1 %v121_v21  ;;  %155 = vmatpush.msra.mxu0 %v116_v24  ;;  %v103_v35 = vld [vmem:[#allocation6 + $0xd8] sm:$0xff]  ;;  %v104_v36 = vld [vmem:[#allocation6 + $0xe0] sm:$0xff]  ;;  %v105_v37 = vld [vmem:[#allocation6 + $0xe8] sm:$0xff] }
  0x1c   :  { %202 = vmatpush.msra.mxu2 %v114_v22  ;;  %225 = vmatpush.msra.mxu3 %v115_v23  ;;  %v98_v38 = vld [vmem:[#allocation6 + $0xb0] sm:$0xff]  ;;  %v99_v39 = vld [vmem:[#allocation6 + $0xb8] sm:$0xff]  ;;  %v100_v40 = vld [vmem:[#allocation6 + $0xc0] sm:$0xff] }
  0x1d   :  { %178 = vmatpush.msra.mxu1 %v117_v25  ;;  %156 = vmatpush.msra.mxu0 %v112_v28  ;;  %v101_v41 = vld [vmem:[#allocation6 + $0xc8] sm:$0xff]  ;;  %v94_v42 = vld [vmem:[#allocation6 + $0x90] sm:$0xff]  ;;  %v95_v43 = vld [vmem:[#allocation6 + $0x98] sm:$0xff] }
  0x1e   :  { %203 = vmatpush.msra.mxu2 %v110_v26  ;;  %226 = vmatpush.msra.mxu3 %v111_v27  ;;  %v96_v44 = vld [vmem:[#allocation6 + $0xa0] sm:$0xff]  ;;  %v97_v45 = vld [vmem:[#allocation6 + $0xa8] sm:$0xff]  ;;  %v90_v46 = vld [vmem:[#allocation6 + $0x70] sm:$0xff] }
  0x1f   :  { %179 = vmatpush.msra.mxu1 %v113_v29  ;;  %157 = vmatpush.msra.mxu0 %v108_v32  ;;  %v91_v47 = vld [vmem:[#allocation6 + $0x78] sm:$0xff]  ;;  %v92_v48 = vld [vmem:[#allocation6 + $0x80] sm:$0xff]  ;;  %v93_v49 = vld [vmem:[#allocation6 + $0x88] sm:$0xff] }
  0x20   :  { %204 = vmatpush.msra.mxu2 %v106_v30  ;;  %227 = vmatpush.msra.mxu3 %v107_v31  ;;  %v86_v50 = vld [vmem:[#allocation6 + $0x50] sm:$0xff]  ;;  %v87_v51 = vld [vmem:[#allocation6 + $0x58] sm:$0xff]  ;;  %v88_v52 = vld [vmem:[#allocation6 + $0x60] sm:$0xff] }
  0x21   :  { %180 = vmatpush.msra.mxu1 %v109_v33  ;;  %158 = vmatpush.msra.mxu0 %v104_v36  ;;  %v89_v53 = vld [vmem:[#allocation6 + $0x68] sm:$0xff]  ;;  %v82_v54 = vld [vmem:[#allocation6 + $0x30] sm:$0xff]  ;;  %v83_v55 = vld [vmem:[#allocation6 + $0x38] sm:$0xff] }
  0x22   :  { %205 = vmatpush.msra.mxu2 %v102_v34  ;;  %228 = vmatpush.msra.mxu3 %v103_v35  ;;  %v84_v56 = vld [vmem:[#allocation6 + $0x40] sm:$0xff]  ;;  %v85_v57 = vld [vmem:[#allocation6 + $0x48] sm:$0xff]  ;;  %v78_v58 = vld [vmem:[#allocation6 + $0x10] sm:$0xff] }
  0x23   :  { %181 = vmatpush.msra.mxu1 %v105_v37  ;;  %159 = vmatpush.msra.mxu0 %v100_v40  ;;  %v79_v59 = vld [vmem:[#allocation6 + $0x18] sm:$0xff]  ;;  %v74_v60 = vld [vmem:[#allocation3] sm:$0xff]  ;;  %v80_v61 = vld [vmem:[#allocation6 + $0x20] sm:$0xff] }
  0x24   :  { %206 = vmatpush.msra.mxu2 %v98_v38  ;;  %229 = vmatpush.msra.mxu3 %v99_v39  ;;  %v81_v62 = vld [vmem:[#allocation6 + $0x28] sm:$0xff]  ;;  %v299_v63 = vld [vmem:[#allocation8 + $0x178] sm:$0xff]  ;;  %v76_v1 = vld [vmem:[#allocation6] sm:$0xff] }
  0x25   :  { %182 = vmatpush.msra.mxu1 %v101_v41  ;;  %160 = vmatpush.msra.mxu0 %v96_v44  ;;  %v315_v0 = vld [vmem:[#allocation8 + $0x1f8] sm:$0xff]  ;;  %v77_v2 = vld [vmem:[#allocation6 + $0x8] sm:$0xff]  ;;  %v298_v3 = vld [vmem:[#allocation8 + $0x170] sm:$0xff] }
  0x26   :  { %207 = vmatpush.msra.mxu2 %v94_v42  ;;  %230 = vmatpush.msra.mxu3 %v95_v43  ;;  %v267_v4 = vld [vmem:[#allocation8 + $0x78] sm:$0xff]  ;;  %v314_v6 = vld [vmem:[#allocation8 + $0x1f0] sm:$0xff]  ;;  %v297_v7 = vld [vmem:[#allocation8 + $0x168] sm:$0xff] }
  0x27   :  { %183 = vmatpush.msra.mxu1 %v97_v45  ;;  %161 = vmatpush.msra.mxu0 %v92_v48  ;;  %v283_v5 = vld [vmem:[#allocation8 + $0xf8] sm:$0xff]  ;;  %v266_v8 = vld [vmem:[#allocation8 + $0x70] sm:$0xff]  ;;  %v296_v11 = vld [vmem:[#allocation8 + $0x160] sm:$0xff] }
  0x28   :  { %208 = vmatpush.msra.mxu2 %v90_v46  ;;  %231 = vmatpush.msra.mxu3 %v91_v47  ;;  %v75_v9 = vld [vmem:[#allocation3 + $0x8] sm:$0xff]  ;;  %v282_v10 = vld [vmem:[#allocation8 + $0xf0] sm:$0xff]  ;;  %v313_v12 = vld [vmem:[#allocation8 + $0x1e8] sm:$0xff] }
  0x29   :  { %184 = vmatpush.msra.mxu1 %v93_v49  ;;  %162 = vmatpush.msra.mxu0 %v88_v52  ;;  %v265_v13 = vld [vmem:[#allocation8 + $0x68] sm:$0xff]  ;;  %v295_v15 = vld [vmem:[#allocation8 + $0x158] sm:$0xff]  ;;  %v312_v16 = vld [vmem:[#allocation8 + $0x1e0] sm:$0xff] }
  0x2a   :  { %209 = vmatpush.msra.mxu2 %v86_v50  ;;  %232 = vmatpush.msra.mxu3 %v87_v51  ;;  %v281_v14 = vld [vmem:[#allocation8 + $0xe8] sm:$0xff]  ;;  %v264_v17 = vld [vmem:[#allocation8 + $0x60] sm:$0xff]  ;;  %v294_v19 = vld [vmem:[#allocation8 + $0x150] sm:$0xff] }
  0x2b   :  { %185 = vmatpush.msra.mxu1 %v89_v53  ;;  %163 = vmatpush.msra.mxu0 %v84_v56  ;;  %v280_v18 = vld [vmem:[#allocation8 + $0xe0] sm:$0xff]  ;;  %v311_v20 = vld [vmem:[#allocation8 + $0x1d8] sm:$0xff]  ;;  %v293_v23 = vld [vmem:[#allocation8 + $0x148] sm:$0xff] }
  0x2c   :  { %210 = vmatpush.msra.mxu2 %v82_v54  ;;  %233 = vmatpush.msra.mxu3 %v83_v55  ;;  %v263_v21 = vld [vmem:[#allocation8 + $0x58] sm:$0xff]  ;;  %v310_v24 = vld [vmem:[#allocation8 + $0x1d0] sm:$0xff]  ;;  %v292_v27 = vld [vmem:[#allocation8 + $0x140] sm:$0xff] }
  0x2d   :  { %186 = vmatpush.msra.mxu1 %v85_v57  ;;  %164 = vmatpush.msra.mxu0 %v80_v61  ;;  %v279_v22 = vld [vmem:[#allocation8 + $0xd8] sm:$0xff]  ;;  %v262_v25 = vld [vmem:[#allocation8 + $0x50] sm:$0xff]  ;;  %v309_v28 = vld [vmem:[#allocation8 + $0x1c8] sm:$0xff] }
  0x2e   :  { %211 = vmatpush.msra.mxu2 %v78_v58  ;;  %234 = vmatpush.msra.mxu3 %v79_v59  ;;  %v278_v26 = vld [vmem:[#allocation8 + $0xd0] sm:$0xff]  ;;  %v261_v29 = vld [vmem:[#allocation8 + $0x48] sm:$0xff]  ;;  %v291_v31 = vld [vmem:[#allocation8 + $0x138] sm:$0xff] }
  0x2f   :  { %212 = vmatmul.f32.vlgmr.msra.gmra.mxu2 %v74_v60  ;;  %235 = vmatmul.f32.vlgmr.msra.gmra.mxu3 %v74_v60  ;;  %v277_v30 = vld [vmem:[#allocation8 + $0xc8] sm:$0xff]  ;;  %v308_v32 = vld [vmem:[#allocation8 + $0x1c0] sm:$0xff]  ;;  %v290_v35 = vld [vmem:[#allocation8 + $0x130] sm:$0xff] }
  0x30   :  { %187 = vmatpush.msra.mxu1 %v81_v62  ;;  %362 = vmatpush.msrb.mxu2 %v299_v63  ;;  %v260_v33 = vld [vmem:[#allocation8 + $0x40] sm:$0xff]  ;;  %v307_v36 = vld [vmem:[#allocation8 + $0x1b8] sm:$0xff]  ;;  %v289_v39 = vld [vmem:[#allocation8 + $0x128] sm:$0xff] }
  0x31   :  { %385 = vmatpush.msrb.mxu3 %v315_v0  ;;  %165 = vmatpush.msra.mxu0 %v76_v1  ;;  %v276_v34 = vld [vmem:[#allocation8 + $0xc0] sm:$0xff]  ;;  %v259_v37 = vld [vmem:[#allocation8 + $0x38] sm:$0xff]  ;;  %v306_v40 = vld [vmem:[#allocation8 + $0x1b0] sm:$0xff] }
  0x32   :  { %188 = vmatpush.msra.mxu1 %v77_v2  ;;  %166 = vmatmul.f32.vlgmr.msra.gmra.mxu0 %v74_v60  ;;  %v275_v38 = vld [vmem:[#allocation8 + $0xb8] sm:$0xff]  ;;  %v258_v41 = vld [vmem:[#allocation8 + $0x30] sm:$0xff]  ;;  %v288_v43 = vld [vmem:[#allocation8 + $0x120] sm:$0xff] }
  0x33   :  { %189 = vmatmul.f32.vlgmr.msra.gmra.mxu1 %v74_v60  ;;  %363 = vmatpush.msrb.mxu2 %v298_v3  ;;  %v274_v42 = vld [vmem:[#allocation8 + $0xb0] sm:$0xff]  ;;  %v305_v44 = vld [vmem:[#allocation8 + $0x1a8] sm:$0xff]  ;;  %v287_v47 = vld [vmem:[#allocation8 + $0x118] sm:$0xff] }
  0x34   :  { %316 = vmatpush.msrb.mxu0 %v267_v4  ;;  %339 = vmatpush.msrb.mxu1 %v283_v5  ;;  %v257_v45 = vld [vmem:[#allocation8 + $0x28] sm:$0xff]  ;;  %v304_v48 = vld [vmem:[#allocation8 + $0x1a0] sm:$0xff]  ;;  %v286_v51 = vld [vmem:[#allocation8 + $0x110] sm:$0xff] }
  0x35   :  { %386 = vmatpush.msrb.mxu3 %v314_v6  ;;  %364 = vmatpush.msrb.mxu2 %v297_v7  ;;  %v273_v46 = vld [vmem:[#allocation8 + $0xa8] sm:$0xff]  ;;  %v256_v49 = vld [vmem:[#allocation8 + $0x20] sm:$0xff]  ;;  %v303_v52 = vld [vmem:[#allocation8 + $0x198] sm:$0xff] }
  0x36   :  { %317 = vmatpush.msrb.mxu0 %v266_v8  ;;  %340 = vmatpush.msrb.mxu1 %v282_v10  ;;  %v272_v50 = vld [vmem:[#allocation8 + $0xa0] sm:$0xff]  ;;  %v255_v53 = vld [vmem:[#allocation8 + $0x18] sm:$0xff]  ;;  %v285_v55 = vld [vmem:[#allocation8 + $0x108] sm:$0xff] }
  0x37   :  { %215 = vmatmul.f32.gmra.mxu2 %v75_v9  ;;  %238 = vmatmul.f32.gmra.mxu3 %v75_v9  ;;  %v271_v54 = vld [vmem:[#allocation8 + $0x98] sm:$0xff]  ;;  %v302_v56 = vld [vmem:[#allocation8 + $0x190] sm:$0xff]  ;;  %v284_v59 = vld [vmem:[#allocation8 + $0x100] sm:$0xff] }
  0x38   :  { %365 = vmatpush.msrb.mxu2 %v296_v11  ;;  %387 = vmatpush.msrb.mxu3 %v313_v12  ;;  %v254_v57 = vld [vmem:[#allocation8 + $0x10] sm:$0xff]  ;;  %v301_v60 = vld [vmem:[#allocation8 + $0x188] sm:$0xff]  ;;  %v300_v63 = vld [vmem:[#allocation8 + $0x180] sm:$0xff] }
  0x39   :  { %318 = vmatpush.msrb.mxu0 %v265_v13  ;;  %341 = vmatpush.msrb.mxu1 %v281_v14  ;;  %v270_v58 = vld [vmem:[#allocation8 + $0x90] sm:$0xff]  ;;  %v253_v61 = vld [vmem:[#allocation8 + $0x8] sm:$0xff]  ;;  %v252_v0 = vld [vmem:[#allocation8] sm:$0xff] }
  0x3a   :  { %366 = vmatpush.msrb.mxu2 %v295_v15  ;;  %169 = vmatmul.f32.gmra.mxu0 %v75_v9  ;;  %v269_v62 = vld [vmem:[#allocation8 + $0x88] sm:$0xff]  ;;  %v268_v1 = vld [vmem:[#allocation8 + $0x80] sm:$0xff]  ;;  %v140_v2 = vld [vmem:[%s623_s2] sm:$0xf] }
  0x3b   :  { %192 = vmatmul.f32.gmra.mxu1 %v75_v9  ;;  %388 = vmatpush.msrb.mxu3 %v312_v16  ;;  %v142_v3 = vperm.slane %v140_v2, 0  ;;  %v143_v4 = vperm.slane %v140_v2, 1  ;;  %v144_v5 = vperm.slane %v140_v2, 2  ;;  %v145_v6 = vperm.slane %v140_v2, 3 }
  0x3c   :  { %319 = vmatpush.msrb.mxu0 %v264_v17  ;;  %342 = vmatpush.msrb.mxu1 %v280_v18 }
  0x3d   :  { %367 = vmatpush.msrb.mxu2 %v294_v19  ;;  %389 = vmatpush.msrb.mxu3 %v311_v20 }
  0x3e   :  { %320 = vmatpush.msrb.mxu0 %v263_v21  ;;  %343 = vmatpush.msrb.mxu1 %v279_v22 }
  0x3f   :  { %368 = vmatpush.msrb.mxu2 %v293_v23  ;;  %390 = vmatpush.msrb.mxu3 %v310_v24 }
  0x40   :  { %321 = vmatpush.msrb.mxu0 %v262_v25  ;;  %344 = vmatpush.msrb.mxu1 %v278_v26 }
  0x41   :  { %369 = vmatpush.msrb.mxu2 %v292_v27  ;;  %391 = vmatpush.msrb.mxu3 %v309_v28 }
  0x42   :  { %322 = vmatpush.msrb.mxu0 %v261_v29  ;;  %345 = vmatpush.msrb.mxu1 %v277_v30 }
  0x43   :  { %370 = vmatpush.msrb.mxu2 %v291_v31  ;;  %392 = vmatpush.msrb.mxu3 %v308_v32 }
  0x44   :  { %323 = vmatpush.msrb.mxu0 %v260_v33  ;;  %346 = vmatpush.msrb.mxu1 %v276_v34 }
  0x45   :  { %371 = vmatpush.msrb.mxu2 %v290_v35  ;;  %393 = vmatpush.msrb.mxu3 %v307_v36 }
  0x46   :  { %324 = vmatpush.msrb.mxu0 %v259_v37  ;;  %347 = vmatpush.msrb.mxu1 %v275_v38  ;;  %v453_v37 = vld [vmem:[%s625_s4] ss:$0 sm:$0xff] }
  0x47   :  { %372 = vmatpush.msrb.mxu2 %v289_v39  ;;  %394 = vmatpush.msrb.mxu3 %v306_v40 }
  0x48   :  { %325 = vmatpush.msrb.mxu0 %v258_v41  ;;  %348 = vmatpush.msrb.mxu1 %v274_v42 }
  0x49   :  { %373 = vmatpush.msrb.mxu2 %v288_v43  ;;  %395 = vmatpush.msrb.mxu3 %v305_v44 }
  0x4a   :  { %326 = vmatpush.msrb.mxu0 %v257_v45  ;;  %349 = vmatpush.msrb.mxu1 %v273_v46 }
  0x4b   :  { %374 = vmatpush.msrb.mxu2 %v287_v47  ;;  %396 = vmatpush.msrb.mxu3 %v304_v48 }
  0x4c   :  { %327 = vmatpush.msrb.mxu0 %v256_v49  ;;  %350 = vmatpush.msrb.mxu1 %v272_v50 }
  0x4d   :  { %375 = vmatpush.msrb.mxu2 %v286_v51  ;;  %397 = vmatpush.msrb.mxu3 %v303_v52 }
  0x4e   :  { %328 = vmatpush.msrb.mxu0 %v255_v53  ;;  %351 = vmatpush.msrb.mxu1 %v271_v54 }
  0x4f   :  { %376 = vmatpush.msrb.mxu2 %v285_v55  ;;  %398 = vmatpush.msrb.mxu3 %v302_v56 }
  0x50   :  { %329 = vmatpush.msrb.mxu0 %v254_v57  ;;  %352 = vmatpush.msrb.mxu1 %v270_v58 }
  0x51   :  { %377 = vmatpush.msrb.mxu2 %v284_v59  ;;  %399 = vmatpush.msrb.mxu3 %v301_v60 }
  0x52   :  { %330 = vmatpush.msrb.mxu0 %v253_v61  ;;  %353 = vmatpush.msrb.mxu1 %v269_v62 }
  0x53   :  { %400 = vmatpush.msrb.mxu3 %v300_v63 }
  0x54   :  { %331 = vmatpush.msrb.mxu0 %v252_v0  ;;  %354 = vmatpush.msrb.mxu1 %v268_v1 }
  0xaf   :  { %v167_v7 = vpop.f32.mrf.mxu0 }
  0xb0   :  { %v190_v8 = vpop.f32.mrf.mxu1  ;;  %v168_v9 = vadd.f32 %v167_v7, %v142_v3 }
  0xb1   :  { %v191_v10 = vadd.f32 %v190_v8, %v143_v4 }
  0xb2   :  { %v213_v11 = vpop.f32.mrf.mxu2  ;;  %v236_v12 = vpop.f32.mrf.mxu3  ;;  %v242_v15 = vmax.f32 %v168_v9, 0.0 }
  0xb3   :  { %v214_v13 = vadd.f32 %v213_v11, %v144_v5  ;;  %v237_v14 = vadd.f32 %v236_v12, %v145_v6  ;;  %v243_v16 = vmax.f32 %v191_v10, 0.0 }
  0xb4   :  { %332 = vmatmul.f32.vlgmr.msrb.gmra.mxu0 %v242_v15 }
  0xb5   :  { %v244_v17 = vmax.f32 %v214_v13, 0.0  ;;  %v245_v18 = vmax.f32 %v237_v14, 0.0  ;;  %355 = vmatmul.f32.vlgmr.msrb.gmra.mxu1 %v243_v16 }
  0xb7   :  { %378 = vmatmul.f32.vlgmr.msrb.gmra.mxu2 %v244_v17  ;;  %401 = vmatmul.f32.vlgmr.msrb.gmra.mxu3 %v245_v18  ;;  %v170_v19 = vpop.f32.mrf.mxu0 }
  0xb8   :  { %v193_v20 = vpop.f32.mrf.mxu1  ;;  %v171_v21 = vadd.f32 %v170_v19, %v142_v3 }
  0xb9   :  { %v194_v22 = vadd.f32 %v193_v20, %v143_v4 }
  0xba   :  { %v216_v23 = vpop.f32.mrf.mxu2  ;;  %v239_v24 = vpop.f32.mrf.mxu3  ;;  %v246_v27 = vmax.f32 %v171_v21, 0.0 }
  0xbb   :  { %v217_v25 = vadd.f32 %v216_v23, %v144_v5  ;;  %v240_v26 = vadd.f32 %v239_v24, %v145_v6  ;;  %v247_v28 = vmax.f32 %v194_v22, 0.0 }
  0xbc   :  { %335 = vmatmul.f32.gmra.mxu0 %v246_v27 }
  0xbd   :  { %v248_v29 = vmax.f32 %v217_v25, 0.0  ;;  %v249_v30 = vmax.f32 %v240_v26, 0.0  ;;  %358 = vmatmul.f32.gmra.mxu1 %v247_v28 }
  0xbf   :  { %381 = vmatmul.f32.gmra.mxu2 %v248_v29  ;;  %404 = vmatmul.f32.gmra.mxu3 %v249_v30 }
 0x131   :  { %v333_v31 = vpop.f32.mrf.mxu0 }
 0x132   :  { %v356_v32 = vpop.f32.mrf.mxu1 }
 0x133   :  { %v357_v33 = vadd.f32 %v356_v32, %v333_v31 }
 0x139   :  { %v336_v38 = vpop.f32.mrf.mxu0 }
 0x13a   :  { %v379_v34 = vpop.f32.mrf.mxu2  ;;  %v402_v35 = vpop.f32.mrf.mxu3 }
 0x13b   :  { %v380_v36 = vadd.f32 %v379_v34, %v357_v33  ;;  %v359_v39 = vpop.f32.mrf.mxu1 }
 0x13c   :  { %v360_v42 = vadd.f32 %v359_v39, %v336_v38 }
 0x13d   :  { %v403_v40 = vadd.f32 %v402_v35, %v380_v36 }
 0x13f   :  { %v421_v41 = vadd.f32 %v453_v37, %v403_v40 }
 0x141   :  { %423 = vst [vmem:[#allocation9] sm:$0xff] %v421_v41 }
 0x142   :  { %v382_v43 = vpop.f32.mrf.mxu2  ;;  %v405_v44 = vpop.f32.mrf.mxu3 }
 0x143   :  { %v383_v45 = vadd.f32 %v382_v43, %v360_v42 }
 0x145   :  { %v406_v46 = vadd.f32 %v405_v44, %v383_v45 }
 0x147   :  { %v422_v47 = vadd.f32 %v453_v37, %v406_v46 }
 0x149   :  { %424 = vst [vmem:[#allocation9 + $0x8] sm:$0xff] %v422_v47 }
 0x14a   :  { %437 = dma.vmem_to_hbm [thread:$0]  %s430_s13, 256, %s432_s16, [#allocation5], %s560_s30, %s560_s30, %s561_s6  }
 0x14b   :  { %554 = dma.done.wait [#allocation5], 256  }
 0x14c   :  { %555 = vsyncadd [#allocation5], 4294967040 }
 0x14d   :  { %442 = vsyncpa [#allocation4], 1 }
 0x14e   :  { %443 = vsyncpa [#allocation7], 1 }
 0x14f   :  { %444 = vsyncpa [#allocation5], 1 }

</bundles_post_ra>
